<compile_context>
chip_gen: v7x
topology: tpu7x:2x2x1
jax: 0.10.0
libtpu: 0.0.40
codegen_flags: <defaults>
</compile_context>

<pallas_src>
import functools

import jax
import jax.numpy as jnp
from jax.experimental import pallas as pl
from jax.experimental.pallas import tpu as pltpu

EPS = 1e-5
_MAX_S_TILE = 128 * 1024                 # lane-axis tile for the two-pass path
_VMEM_LIMIT = 48 * 1024 * 1024           # scoped VMEM limit (<= v7x 64 MiB physical)
_FUSED_VMEM_BUDGET = 36 * 1024 * 1024    # fused path: per-batch working-set budget
_TILED_VMEM_BUDGET = 32 * 1024 * 1024    # tiled path: per-step working-set budget


# ----------------------------- in-kernel helpers -----------------------------

def _conv_1x1(x, w, b):
    """Pointwise conv as full-width VPU FMAs.

    x: (Cin, S) f32;  w: (Cout, Cin) f32;  b: (Cout, 1) f32  ->  (Cout, S) f32.
    Every multiply/add covers the full (Cout, S) value.
    """
    cin = x.shape[0]
    acc = b + w[:, 0:1] * x[0:1, :]
    for ci in range(1, cin):
        acc = acc + w[:, ci:ci + 1] * x[ci:ci + 1, :]
    return acc


def _activate(y, activation):
    if activation == "Sigmoid":
        return jax.nn.sigmoid(y)
    # Softmax over the channel (sublane) axis.
    m = jnp.max(y, axis=0, keepdims=True)
    e = jnp.exp(y - m)
    denom = jnp.sum(e, axis=0, keepdims=True)
    r = pl.reciprocal(denom, approx=True)    # EUP seed (off the VPU critical path)
    r = r * (2.0 - denom * r)                # one Newton step -> ~f32 accuracy
    return e * r


# ------------------------------ fused fast path -------------------------------

def _fused_kernel(x_ref, w_ref, b_ref, o_ref, *, activation):
    x = x_ref[0].astype(jnp.float32)                    # (Cin, S)
    y = _conv_1x1(x, w_ref[...], b_ref[...])            # (Cout, S)
    mean = jnp.mean(y, axis=-1, keepdims=True)          # (Cout, 1)
    c = y - mean
    var = jnp.mean(c * c, axis=-1, keepdims=True)       # centered (accurate) biased var
    y = c * jax.lax.rsqrt(var + EPS)
    o_ref[0] = _activate(y, activation).astype(o_ref.dtype)


# ------------------------------ two-pass tiled path ---------------------------

def _stats_kernel(x_ref, w_ref, b_ref, mean_ref, rstd_ref, sum_ref, sq_ref,
                  *, s_valid, s_tile, n_tiles):
    t = pl.program_id(1)

    @pl.when(t == 0)
    def _():
        sum_ref[...] = jnp.zeros_like(sum_ref)
        sq_ref[...] = jnp.zeros_like(sq_ref)

    y = _conv_1x1(x_ref[0].astype(jnp.float32), w_ref[...], b_ref[...])  # (Cout, s_tile)

    rem = s_valid - (n_tiles - 1) * s_tile   # static: valid columns of the last tile
    if rem == s_tile:
        # No ragged tile -> no masking anywhere.
        sum_ref[...] += jnp.sum(y, axis=-1, keepdims=True)
        sq_ref[...] += jnp.sum(y * y, axis=-1, keepdims=True)
    else:
        is_edge = t == n_tiles - 1

        @pl.when(jnp.logical_not(is_edge))
        def _():
            sum_ref[...] += jnp.sum(y, axis=-1, keepdims=True)
            sq_ref[...] += jnp.sum(y * y, axis=-1, keepdims=True)

        @pl.when(is_edge)
        def _():
            # Only the final spatial tile pays for the mask (garbage past S).
            col = jax.lax.broadcasted_iota(jnp.int32, y.shape, 1)
            ym = jnp.where(col < rem, y, 0.0)
            sum_ref[...] += jnp.sum(ym, axis=-1, keepdims=True)
            sq_ref[...] += jnp.sum(ym * ym, axis=-1, keepdims=True)

    @pl.when(t == n_tiles - 1)
    def _():
        inv_n = jnp.float32(1.0 / s_valid)
        mean = sum_ref[...] * inv_n
        # TODO(synk): E[y^2]-mean^2 can cancel when |mean| >> std at very large S;
        # switch to shifted/Welford accumulation if that regime matters.
        var = jnp.maximum(sq_ref[...] * inv_n - mean * mean, 0.0)
        mean_ref[0] = mean
        rstd_ref[0] = jax.lax.rsqrt(var + EPS)


def _apply_kernel(x_ref, w_ref, b_ref, mean_ref, rstd_ref, o_ref, *, activation):
    y = _conv_1x1(x_ref[0].astype(jnp.float32), w_ref[...], b_ref[...])  # (Cout, s_tile)
    y = (y - mean_ref[0]) * rstd_ref[0]                                  # (Cout,1) broadcast
    o_ref[0] = _activate(y, activation).astype(o_ref.dtype)
    # Ragged last block: Pallas masks the out-of-bounds part of the writeback.


# ---------------------------------- wrapper -----------------------------------

def outlayer_forward(x_ncdhw, weight, bias, activation, *,
                     force_two_pass=False, s_tile_override=None):
    """x_ncdhw: (N, Cin, D, H, W); weight: (Cout, Cin[,1,1,1]); bias: (Cout,).

    s_tile_override (testing only) must be a multiple of 128 or >= S.
    """
    if activation not in ("Sigmoid", "Softmax"):
        raise ValueError("Unproper Activation")

    N, Cin, D, H, W = x_ncdhw.shape
    weight = weight.reshape(weight.shape[0], -1).astype(jnp.float32)     # (Cout, Cin)
    Cout = weight.shape[0]
    bias2 = bias.reshape(Cout, 1).astype(jnp.float32)                    # (Cout, 1)
    S = D * H * W
    out_dtype = x_ncdhw.dtype

    x = x_ncdhw.reshape(N, Cin, S)   # free reshape: channels on sublanes, spatial on lanes

    x_bytes = x_ncdhw.dtype.itemsize
    out_bytes = jnp.dtype(out_dtype).itemsize
    per_col_bytes = 2 * Cin * x_bytes + 2 * Cout * out_bytes + 3 * Cout * 4

    w_spec = pl.BlockSpec((Cout, Cin), lambda n, t: (0, 0))
    b_spec = pl.BlockSpec((Cout, 1), lambda n, t: (0, 0))

    # ---- fused single-pass fast path: whole (Cin, S) slab resident in VMEM ----
    fused_bytes = S * per_col_bytes
    if (not force_two_pass) and fused_bytes <= _FUSED_VMEM_BUDGET:
        out = pl.pallas_call(
            functools.partial(_fused_kernel, activation=activation),
            out_shape=jax.ShapeDtypeStruct((N, Cout, S), out_dtype),
            grid_spec=pltpu.PrefetchScalarGridSpec(
                num_scalar_prefetch=0,
                grid=(N,),
                in_specs=[pl.BlockSpec((1, Cin, S), lambda n: (n, 0, 0)),
                          pl.BlockSpec((Cout, Cin), lambda n: (0, 0)),
                          pl.BlockSpec((Cout, 1), lambda n: (0, 0))],
                out_specs=pl.BlockSpec((1, Cout, S), lambda n: (n, 0, 0)),
            ),
            compiler_params=pltpu.CompilerParams(
                dimension_semantics=("parallel",),
                vmem_limit_bytes=_VMEM_LIMIT,
            ),
        )(x, weight, bias2)
        return out.reshape(N, Cout, D, H, W)

    # ---- two-pass tiled path (large volumes) ----
    if s_tile_override is not None:
        s_tile = min(int(s_tile_override), S) if s_tile_override >= S else int(s_tile_override)
    elif S <= _MAX_S_TILE:
        s_tile = S
    else:
        cap = max(512, (_TILED_VMEM_BUDGET // per_col_bytes) // 128 * 128)
        s_tile = min(_MAX_S_TILE, cap)
    n_tiles = pl.cdiv(S, s_tile)

    x_spec = pl.BlockSpec((1, Cin, s_tile), lambda n, t: (n, 0, t))
    stat_spec = pl.BlockSpec((1, Cout, 1), lambda n, t: (n, 0, 0))

    # Pass 1: per-(n, c) mean / rstd over all spatial tiles (no wrapper-side pad).
    mean, rstd = pl.pallas_call(
        functools.partial(_stats_kernel, s_valid=S, s_tile=s_tile, n_tiles=n_tiles),
        out_shape=(jax.ShapeDtypeStruct((N, Cout, 1), jnp.float32),
                   jax.ShapeDtypeStruct((N, Cout, 1), jnp.float32)),
        grid_spec=pltpu.PrefetchScalarGridSpec(
            num_scalar_prefetch=0,
            grid=(N, n_tiles),
            in_specs=[x_spec, w_spec, b_spec],
            out_specs=(stat_spec, stat_spec),
            scratch_shapes=[pltpu.VMEM((Cout, 1), jnp.float32),
                            pltpu.VMEM((Cout, 1), jnp.float32)],
        ),
        compiler_params=pltpu.CompilerParams(
            dimension_semantics=("parallel", "arbitrary"),
            vmem_limit_bytes=_VMEM_LIMIT,
        ),
    )(x, weight, bias2)

    # Pass 2: recompute the cheap conv, normalize, activate; lane-dense stores,
    # ragged last tile handled by Pallas (no trailing slice in the wrapper).
    out = pl.pallas_call(
        functools.partial(_apply_kernel, activation=activation),
        out_shape=jax.ShapeDtypeStruct((N, Cout, S), out_dtype),
        grid_spec=pltpu.PrefetchScalarGridSpec(
            num_scalar_prefetch=0,
            grid=(N, n_tiles),
            in_specs=[x_spec, w_spec, b_spec, stat_spec, stat_spec],
            out_specs=pl.BlockSpec((1, Cout, s_tile), lambda n, t: (n, 0, t)),
        ),
        compiler_params=pltpu.CompilerParams(
            dimension_semantics=("parallel", "parallel"),
            vmem_limit_bytes=_VMEM_LIMIT,
        ),
    )(x, weight, bias2, mean, rstd)

    return out.reshape(N, Cout, D, H, W)


# --------------------------------- reference ----------------------------------

def _reference(x_ncdhw, weight, bias, activation):
    # Pure-JAX reference mirroring PyTorch: Conv3d(1x1x1) -> InstanceNorm3d -> act.
    weight = weight.reshape(weight.shape[0], -1)
    y = jnp.einsum("ncdhw,oc->nodhw", x_ncdhw, weight) + bias[None, :, None, None, None]
    mean = jnp.mean(y, axis=(2, 3, 4), keepdims=True)
    var = jnp.mean((y - mean) ** 2, axis=(2, 3, 4), keepdims=True)
    y = (y - mean) / jnp.sqrt(var + EPS)
    if activation == "Sigmoid":
        return jax.nn.sigmoid(y)
    return jax.nn.softmax(y, axis=1)


if __name__ == "__main__":
    key = jax.random.PRNGKey(0)
    k_x, k_w, k_b, k_x2 = jax.random.split(key, 4)

    N, Cin, Cout = 2, 4, 4
    weight = jax.random.normal(k_w, (Cout, Cin), dtype=jnp.float32) * 0.1
    bias = jax.random.normal(k_b, (Cout,), dtype=jnp.float32) * 0.1

    ok = True

    # Fused single-pass path (small volume, S = 512).
    x = jax.random.normal(k_x, (N, Cin, 8, 8, 8), dtype=jnp.float32)
    for act in ("Softmax", "Sigmoid"):
        out = outlayer_forward(x, weight, bias, act)
        jax.block_until_ready(out)
        ref = _reference(x, weight, bias, act)
        ok = ok and bool(jnp.allclose(out, ref, atol=1e-4, rtol=1e-4))

    # Two-pass tiled path with a ragged last spatial tile (S = 210, tile = 128).
    x2 = jax.random.normal(k_x2, (N, Cin, 5, 6, 7), dtype=jnp.float32)
    for act in ("Softmax", "Sigmoid"):
        out = outlayer_forward(x2, weight, bias, act,
                               force_two_pass=True, s_tile_override=128)
        jax.block_until_ready(out)
        ref = _reference(x2, weight, bias, act)
        ok = ok and bool(jnp.allclose(out, ref, atol=1e-4, rtol=1e-4))

    if ok:
        print("KERNEL_OK")
</pallas_src>

<mosaic_0001>
module attributes {stable_mosaic.version = 11 : i64} {
  func.func @_fused_kernel(%arg0: i32, %arg1: memref<1x4x512xf32, #tpu.memory_space<vmem>>, %arg2: memref<4x4xf32, #tpu.memory_space<vmem>>, %arg3: memref<4x1xf32, #tpu.memory_space<vmem>>, %arg4: memref<1x4x512xf32, #tpu.memory_space<vmem>>) attributes {dimension_semantics = [#tpu.dimension_semantics<parallel>], iteration_bounds = array<i64: 2>, scalar_prefetch = 0 : i64, scratch_operands = 0 : i64, tpu.core_type = #tpu.core_type<tc>, window_params = [{transform_indices = @transform_0, window_bounds = array<i64: 1, 4, 512>}, {pipeline_mode = #tpu.pipeline_mode<synchronous>, transform_indices = @transform_1, window_bounds = array<i64: 4, 4>}, {pipeline_mode = #tpu.pipeline_mode<synchronous>, transform_indices = @transform_2, window_bounds = array<i64: 4, 1>}, {transform_indices = @transform_3, window_bounds = array<i64: 1, 4, 512>}]} {
    %c0 = arith.constant 0 : index
    %c0_0 = arith.constant 0 : index
    %c0_1 = arith.constant 0 : index
    %0 = vector.load %arg1[%c0, %c0_0, %c0_1] : memref<1x4x512xf32, #tpu.memory_space<vmem>>, vector<1x4x512xf32>
    %1 = vector.shape_cast %0 : vector<1x4x512xf32> to vector<4x512xf32>
    %c0_2 = arith.constant 0 : index
    %c0_3 = arith.constant 0 : index
    %2 = vector.load %arg2[%c0_2, %c0_3] : memref<4x4xf32, #tpu.memory_space<vmem>>, vector<4x4xf32>
    %c0_4 = arith.constant 0 : index
    %c0_5 = arith.constant 0 : index
    %3 = vector.load %arg3[%c0_4, %c0_5] : memref<4x1xf32, #tpu.memory_space<vmem>>, vector<4x1xf32>
    %4 = vector.extract_strided_slice %2 {offsets = [0, 0], sizes = [4, 1], strides = [1, 1]} : vector<4x4xf32> to vector<4x1xf32>
    %5 = vector.extract_strided_slice %1 {offsets = [0, 0], sizes = [1, 512], strides = [1, 1]} : vector<4x512xf32> to vector<1x512xf32>
    %6 = vector.broadcast %4 : vector<4x1xf32> to vector<4x512xf32>
    %7 = vector.broadcast %5 : vector<1x512xf32> to vector<4x512xf32>
    %8 = arith.mulf %6, %7 : vector<4x512xf32>
    %9 = vector.broadcast %3 : vector<4x1xf32> to vector<4x512xf32>
    %10 = arith.addf %9, %8 : vector<4x512xf32>
    %11 = vector.extract_strided_slice %2 {offsets = [0, 1], sizes = [4, 1], strides = [1, 1]} : vector<4x4xf32> to vector<4x1xf32>
    %12 = vector.extract_strided_slice %1 {offsets = [1, 0], sizes = [1, 512], strides = [1, 1]} : vector<4x512xf32> to vector<1x512xf32>
    %13 = vector.broadcast %11 : vector<4x1xf32> to vector<4x512xf32>
    %14 = vector.broadcast %12 : vector<1x512xf32> to vector<4x512xf32>
    %15 = arith.mulf %13, %14 : vector<4x512xf32>
    %16 = arith.addf %10, %15 : vector<4x512xf32>
    %17 = vector.extract_strided_slice %2 {offsets = [0, 2], sizes = [4, 1], strides = [1, 1]} : vector<4x4xf32> to vector<4x1xf32>
    %18 = vector.extract_strided_slice %1 {offsets = [2, 0], sizes = [1, 512], strides = [1, 1]} : vector<4x512xf32> to vector<1x512xf32>
    %19 = vector.broadcast %17 : vector<4x1xf32> to vector<4x512xf32>
    %20 = vector.broadcast %18 : vector<1x512xf32> to vector<4x512xf32>
    %21 = arith.mulf %19, %20 : vector<4x512xf32>
    %22 = arith.addf %16, %21 : vector<4x512xf32>
    %23 = vector.extract_strided_slice %2 {offsets = [0, 3], sizes = [4, 1], strides = [1, 1]} : vector<4x4xf32> to vector<4x1xf32>
    %24 = vector.extract_strided_slice %1 {offsets = [3, 0], sizes = [1, 512], strides = [1, 1]} : vector<4x512xf32> to vector<1x512xf32>
    %25 = vector.broadcast %23 : vector<4x1xf32> to vector<4x512xf32>
    %26 = vector.broadcast %24 : vector<1x512xf32> to vector<4x512xf32>
    %27 = arith.mulf %25, %26 : vector<4x512xf32>
    %28 = arith.addf %22, %27 : vector<4x512xf32>
    %cst = arith.constant dense<0.000000e+00> : vector<4xf32>
    %29 = vector.multi_reduction <add>, %28, %cst [1] : vector<4x512xf32> to vector<4xf32>
    %30 = vector.shape_cast %29 : vector<4xf32> to vector<4x1xf32>
    %cst_6 = arith.constant 5.120000e+02 : f32
    %31 = vector.broadcast %cst_6 : f32 to vector<4x1xf32>
    %32 = arith.divf %30, %31 : vector<4x1xf32>
    %33 = vector.broadcast %32 : vector<4x1xf32> to vector<4x512xf32>
    %34 = arith.subf %28, %33 : vector<4x512xf32>
    %35 = arith.mulf %34, %34 : vector<4x512xf32>
    %cst_7 = arith.constant dense<0.000000e+00> : vector<4xf32>
    %36 = vector.multi_reduction <add>, %35, %cst_7 [1] : vector<4x512xf32> to vector<4xf32>
    %37 = vector.shape_cast %36 : vector<4xf32> to vector<4x1xf32>
    %cst_8 = arith.constant 5.120000e+02 : f32
    %38 = vector.broadcast %cst_8 : f32 to vector<4x1xf32>
    %39 = arith.divf %37, %38 : vector<4x1xf32>
    %cst_9 = arith.constant 9.99999974E-6 : f32
    %40 = vector.broadcast %cst_9 : f32 to vector<4x1xf32>
    %41 = arith.addf %39, %40 : vector<4x1xf32>
    %42 = math.rsqrt %41 : vector<4x1xf32>
    %43 = vector.broadcast %42 : vector<4x1xf32> to vector<4x512xf32>
    %44 = arith.mulf %34, %43 : vector<4x512xf32>
    %cst_10 = arith.constant dense<0xFF800000> : vector<512xf32>
    %45 = vector.multi_reduction <maximumf>, %44, %cst_10 [0] : vector<4x512xf32> to vector<512xf32>
    %46 = vector.shape_cast %45 : vector<512xf32> to vector<1x512xf32>
    %47 = vector.broadcast %46 : vector<1x512xf32> to vector<4x512xf32>
    %48 = arith.subf %44, %47 : vector<4x512xf32>
    %49 = math.exp %48 : vector<4x512xf32>
    %cst_11 = arith.constant dense<0.000000e+00> : vector<512xf32>
    %50 = vector.multi_reduction <add>, %49, %cst_11 [0] : vector<4x512xf32> to vector<512xf32>
    %51 = vector.shape_cast %50 : vector<512xf32> to vector<1x512xf32>
    %52 = tpu.reciprocal %51 {approx = true} : vector<1x512xf32> -> vector<1x512xf32>
    %53 = arith.mulf %51, %52 : vector<1x512xf32>
    %cst_12 = arith.constant 2.000000e+00 : f32
    %54 = vector.broadcast %cst_12 : f32 to vector<1x512xf32>
    %55 = arith.subf %54, %53 : vector<1x512xf32>
    %56 = arith.mulf %52, %55 : vector<1x512xf32>
    %57 = vector.broadcast %56 : vector<1x512xf32> to vector<4x512xf32>
    %58 = arith.mulf %49, %57 : vector<4x512xf32>
    %c0_13 = arith.constant 0 : index
    %c0_14 = arith.constant 0 : index
    %c0_15 = arith.constant 0 : index
    %59 = vector.load %arg4[%c0_13, %c0_14, %c0_15] : memref<1x4x512xf32, #tpu.memory_space<vmem>>, vector<1x4x512xf32>
    %60 = vector.shape_cast %59 : vector<1x4x512xf32> to vector<4x512xf32>
    %61 = vector.shape_cast %58 : vector<4x512xf32> to vector<1x4x512xf32>
    tpu.vector_store %arg4[%c0_13, %c0_14, %c0_15], %61 {strides = array<i32>} : memref<1x4x512xf32, #tpu.memory_space<vmem>>, vector<1x4x512xf32>,
    return
  }
  func.func @transform_0(%arg0: i32) -> (i32, i32, i32) {
    %c0_i32 = arith.constant 0 : i32
    %c0_i32_0 = arith.constant 0 : i32
    %c0_i32_1 = arith.constant 0 : i32
    return %arg0, %c0_i32, %c0_i32_0 : i32, i32, i32
  }
  func.func @transform_1(%arg0: i32) -> (i32, i32) {
    %c0_i32 = arith.constant 0 : i32
    %c0_i32_0 = arith.constant 0 : i32
    %c0_i32_1 = arith.constant 0 : i32
    return %c0_i32, %c0_i32_0 : i32, i32
  }
  func.func @transform_2(%arg0: i32) -> (i32, i32) {
    %c0_i32 = arith.constant 0 : i32
    %c0_i32_0 = arith.constant 0 : i32
    %c0_i32_1 = arith.constant 0 : i32
    return %c0_i32, %c0_i32_0 : i32, i32
  }
  func.func @transform_3(%arg0: i32) -> (i32, i32, i32) {
    %c0_i32 = arith.constant 0 : i32
    %c0_i32_0 = arith.constant 0 : i32
    %c0_i32_1 = arith.constant 0 : i32
    return %arg0, %c0_i32, %c0_i32_0 : i32, i32, i32
  }
}

</mosaic_0001>

<bundles_post_ra>
// kernel: tpu_custom_call.1
= control target key start
LH: loop header
LB: loop body
LE: loop exit
PB: predicated region body
PF: predicated region fallthrough
CT: control target
= control target key end

     0   :  { %8 = vsyncpa [#allocation3], 0  ;;  %s1017_s0 = inlined_call_operand.hbm [shape: f32[2,4,512], index: 0, kind: input, shape index: {}]   ;;  %s1018_s1 = inlined_call_operand.vmem [shape: f32[4,4], index: 1, kind: input, shape index: {}]   ;;  %s1019_s2 = inlined_call_operand.vmem [shape: f32[4,1], index: 2, kind: input, shape index: {}]   ;;  %s1020_s3 = inlined_call_operand.hbm [shape: f32[2,4,512], index: 3, kind: output, shape index: {}]  }
   0x1   :  { %10 = vsyncpa [#allocation3 + $0x1], 0 }
   0x2   :  { %11 = vsyncpa [#allocation4], 0 }
   0x3   :  { %13 = vsyncpa [#allocation4 + $0x1], 0  ;;  %s822_s12 = smov 0   ;;  %s824_s13 = smov 0  }
   0x4   :  { %s826_s14 = smov 0   ;;  %s828_s15 = smov 0  }
   0x5 LB: > { %s843_s16 = sadd.s32 4294967295, %s794_s15   ;;  %s610_s17 = sadd.s32 4294967294, %s794_s15   ;;  %s794_s15 = sphi %s828_s15, %s1035_s15   ;;  %s790_s14 = sphi %s826_s14, %s1034_s14   ;;  %s786_s13 = sphi %s824_s13, %s1033_s13   ;;  %s782_s12 = sphi %s822_s12, %s1032_s12  }
   0x6   : > { %s847_s18 = sadd.s32 1, %s794_s15   ;;  %s26_s19 = sadd.s32 1, %s790_s14 }
   0x7   : > { %s23_s20 = ssub.s32 %s794_s15, %s847_s18  ;;  %p33_p0 = scmp.ne.s32.totalorder %s790_s14, %s786_s13 }
   0x8   : > { %p24_p1 = scmp.eq.s32.totalorder %s23_s20, 0  ;;  %p34_p2 = scmp.eq.s32.totalorder %s794_s15, 0 }
   0x9   : > { %p39_p3 = scmp.ne.s32.totalorder %s786_s13, %s782_s12  ;;  %p40_p4 = scmp.eq.s32.totalorder %s843_s16, 0 }
   0xa   : > { %s859_s21 = scalar_select %p24_p1, %s790_s14, %s26_s19  }
   0xb   : > { %p861_p5 = por %p34_p2, %p33_p0  ;;  %p865_p6 = por %p40_p4, %p39_p3 }
   0xc   : > { %p105_p7 = scmp.eq.s32.totalorder %s843_s16, 1  ;;  %p111_p8 = scmp.eq.s32.totalorder %s610_s17, 1 }
   0xd   : > { %p638_p10 = scmp.lt.s32.totalorder %s794_s15, 2  ;;  %s137_s26 = sand.u32 1, %s790_s14  }
   0xe   : > { %p872_p11 = por %p105_p7, %p33_p0  ;;  %p876_p12 = por %p111_p8, %p39_p3 }
   0xf   : > { %s624_s27 = sshll.u32 %s794_s15, 8  ;;  %s613_s28 = sshll.u32 %s137_s26, 4 }
  0x10   : > { %s1024_s24 = scalar_select %p872_p11, 1, 0 }
  0x11   : > { %s1025_s25 = scalar_select %p876_p12, 1, 0 }
  0x12   : > { %s885_s4 = scalar_lea.hbm %s1017_s0, %s624_s27  ;;  %s141_s5 = scalar_lea.vmem [#allocation2], %s613_s28 }
  0x13   : > { %s149_s6 = sshll.u32 %s141_s5, 4  ;;  %p889_p13 = pnand %p638_p10, %p861_p5  ;;  %s893_s6 = int_to_ptr.vmem [resolvable:$true] %s149_s6 }
  0x14   : > { %s138_s8 = scalar_lea.sflag [#allocation3], %s137_s26  ;;  %s698_s9 = scalar_lea.hbm %s885_s4, 256 }
  0x15   : > { %p699_p2 = scmp.ne.s32.totalorder %s885_s4, %s698_s9  ;;  %p700_p3 = pneg %p889_p13 }
  0x16   : > { %s703_s17 = scalar_lea.hbm %s1017_s0, 512  ;;  %p704_p5 = scmp.lt.u32.totalorder %s885_s4, %s1017_s0 }
  0x17   : > { %p701_p4 = pnand %p700_p3, %p699_p2  ;;  %p705_p8 = scmp.lt.u32.totalorder %s703_s17, %s698_s9 }
  0x18   : > { %p707_p9 = scmp.lt.u32.totalorder %s698_s9, %s885_s4 }
  0x19   : > { %p702_p7 = pneg %p701_p4  ;;  %p706_p10 = por %p705_p8, %p704_p5 }
  0x1b   : > { %p708_p0 = por %p707_p9, %p706_p10 }
  0x1d   : > { %p709_p1 = pnand %p708_p0, %p702_p7 }
  0x1f   : > { %712 = shalt.err (!%p709_p1)
}
  0x20   : > { %s713_s22 = scalar_lea.vmem %s893_s6, 256  ;;  %s796_s26 = smov [#allocation2]  }
  0x21   : > { %p714_p2 = scmp.ne.s32.totalorder %s893_s6, %s713_s22  ;;  %s718_s27 = sshll.u32 %s796_s26, 4  ;;  %s719_s27 = int_to_ptr.vmem [resolvable:$false] %s718_s27 }
  0x22   : > { %s720_s28 = scalar_lea.vmem %s719_s27, 512  ;;  %p721_p11 = scmp.lt.s32.totalorder %s893_s6, %s719_s27 }
  0x23   : > { %p716_p4 = pnand %p714_p2, %p700_p3  ;;  %p722_p5 = scmp.lt.s32.totalorder %s720_s28, %s713_s22 }
  0x25   : > { %p717_p12 = pneg %p716_p4  ;;  %p723_p8 = por %p722_p5, %p721_p11 }
  0x27   : > { %p724_p9 = pnand %p723_p8, %p717_p12 }
  0x29   : > { %727 = shalt.err (!%p724_p9)
}
  0x2a   : > { %633 = dma.hbm_to_vmem [thread:$0]  (!%p889_p13), %s885_s4, 256, %s893_s6, %s138_s8  }
  0x2b   : > { %p1027_p0 = scmp.lt.s32.totalorder %s794_s15, 3  ;;  %p1028_p1 = scmp.ge.s32.totalorder %s794_s15, 1 }
  0x2d   : > { %p155_p3 = pnand %p1028_p1, %p1027_p0 }
  0x2e   : > { %s927_s29 = sand.u32 (!%p155_p3), 1, %s786_s13  }
  0x2f   : > { %158 = sbr.rel (%p155_p3) target bundleno = 598 (0x256), region = 32  ;;  %s617_s30 = sshll.u32 (!%p155_p3), %s927_s29, 4 }
  0x30   : > { %s161_s5 = scalar_lea.sflag (!%p155_p3), [#allocation3], %s927_s29  ;;  %s164_s7 = scalar_lea.vmem (!%p155_p3), [#allocation2], %s617_s30 }
  0x36   : > { %773 = dma.done.wait (%p865_p6), %s161_s5, 256  }
  0x37   : > { %775 = vsyncadd (%p865_p6), %s161_s5, 4294967040  ;;  %v797_v0 = vmov 0   ;;  %v798_v1 = vmov 1   ;;  %v189_v2 = vld [vmem:[%s1018_s1] sm:$0xf]  ;;  %v799_v4 = vmov 2   ;;  %v198_v6 = vlaneseq }
  0x38   : > { %676 = vset.pattern.permute.xlu0 %v797_v0  ;;  %677 = vset.pattern.permute.xlu1 %v798_v1  ;;  %v190_v3 = vld [vmem:[%s1019_s2] sm:$0xf]  ;;  %v800_v5 = vmov 3   ;;  %v188_v11 = vld [vmem:[%s164_s7 + $0x8] sm:$0xff]  ;;  %vm391_vm0 = vcmask 1043456   ;;  %s625_s23 = sshll.u32 %s843_s16, 8 }
  0x39   : > { %193 = vperm.xlu0 %676, %v189_v2   ;;  %248 = vperm.xlu1 %677, %v189_v2   ;;  %v199_v7 = vshrl.u32 %v198_v6, 7  ;;  %v187_v10 = vld [vmem:[%s164_s7] sm:$0xff]  ;;  %s186_s10 = scalar_lea.vmem [#allocation5], %s617_s30  ;;  %s973_s20 = scalar_lea.hbm %s1020_s3, %s625_s23 }
  0x3a   : > { %s540_s11 = sshll.u32 %s186_s10, 4  ;;  %s526_s22 = scalar_lea.sflag [#allocation4], %s927_s29  ;;  %s975_s11 = int_to_ptr.vmem [resolvable:$true] %s540_s11 }
  0x3b   : > { %v200_v8 = vsub.s32 0, %v199_v7  ;;  %v204_v9 = vsub.s32 4, %v199_v7  ;;  %v253_v12 = vsub.s32 1, %v199_v7  ;;  %v257_v13 = vsub.s32 5, %v199_v7  ;;  %s728_s16 = scalar_lea.vmem %s975_s11, 256  ;;  %p1029_p11 = scmp.ne.s32.totalorder %s1024_s24, 0 }
  0x3c   : > { %v301_v14 = vsub.s32 2, %v199_v7  ;;  %v305_v15 = vsub.s32 6, %v199_v7  ;;  %v943_v16 = vsub.s32 3, %v199_v7  ;;  %v353_v17 = vsub.s32 7, %v199_v7  ;;  %p729_p6 = scmp.ne.s32.totalorder %s975_s11, %s728_s16  ;;  %s801_s26 = smov [#allocation5]  }
  0x3d   : > { %240 = vperm.xlu0 %676, %v190_v3   ;;  %678 = vset.pattern.permute.xlu1 %v799_v4  ;;  %v201_v18 = vrot.slane %v187_v10, %v200_v8  ;;  %v205_v19 = vrot.slane %v187_v10, %v204_v9  ;;  %v209_v20 = vrot.slane %v188_v11, %v200_v8  ;;  %s732_s27 = sshll.u32 %s801_s26, 4  ;;  %s733_s27 = int_to_ptr.vmem [resolvable:$false] %s732_s27 }
  0x3e   : > { %296 = vperm.xlu1 %678, %v189_v2   ;;  %v213_v21 = vrot.slane %v188_v11, %v204_v9  ;;  %v254_v22 = vrot.slane %v187_v10, %v253_v12  ;;  %v258_v23 = vrot.slane %v187_v10, %v257_v13  ;;  %v262_v24 = vrot.slane %v188_v11, %v253_v12  ;;  %p730_p12 = pnand %p729_p6, %p1029_p11  ;;  %s734_s28 = scalar_lea.vmem %s733_s27, 512 }
  0x3f   : > { %v266_v25 = vrot.slane %v188_v11, %v257_v13  ;;  %v302_v26 = vrot.slane %v187_v10, %v301_v14  ;;  %v306_v27 = vrot.slane %v187_v10, %v305_v15  ;;  %v310_v28 = vrot.slane %v188_v11, %v301_v14  ;;  %p735_p7 = scmp.lt.s32.totalorder %s975_s11, %s733_s27  ;;  %p736_p10 = scmp.lt.s32.totalorder %s734_s28, %s728_s16 }
  0x40   : > { %v314_v29 = vrot.slane %v188_v11, %v305_v15  ;;  %v350_v30 = vrot.slane %v187_v10, %v943_v16  ;;  %v354_v31 = vrot.slane %v187_v10, %v353_v17  ;;  %v358_v32 = vrot.slane %v188_v11, %v943_v16  ;;  %p731_p13 = pneg %p730_p12 }
  0x41   : > { %679 = vset.pattern.permute.xlu0 %v800_v5  ;;  %v362_v33 = vrot.slane %v188_v11, %v353_v17  ;;  %v221_v34 = vrot.slane %v201_v18, %v200_v8  ;;  %v225_v35 = vrot.slane %v205_v19, %v200_v8  ;;  %v229_v36 = vrot.slane %v209_v20, %v200_v8  ;;  %p737_p2 = por %p736_p10, %p735_p7 }
  0x42   : > { %344 = vperm.xlu0 %679, %v189_v2   ;;  %v233_v37 = vrot.slane %v213_v21, %v200_v8  ;;  %v274_v40 = vrot.slane %v254_v22, %v253_v12  ;;  %v278_v41 = vrot.slane %v258_v23, %v253_v12  ;;  %v282_v42 = vrot.slane %v262_v24, %v253_v12 }
  0x43   : > { %v286_v43 = vrot.slane %v266_v25, %v253_v12  ;;  %v322_v44 = vrot.slane %v302_v26, %v301_v14  ;;  %v326_v45 = vrot.slane %v306_v27, %v301_v14  ;;  %v330_v46 = vrot.slane %v310_v28, %v301_v14  ;;  %p738_p4 = pnand %p737_p2, %p731_p13 }
  0x44   : > { %v334_v47 = vrot.slane %v314_v29, %v301_v14  ;;  %v370_v48 = vrot.slane %v350_v30, %v943_v16  ;;  %v374_v49 = vrot.slane %v354_v31, %v943_v16  ;;  %v378_v50 = vrot.slane %v358_v32, %v943_v16 }
  0x45   : > { %v382_v51 = vrot.slane %v362_v33, %v943_v16 }
  0xb8   : > { %v194_v38 = vpop.permute.xlu0 %193  ;;  %v249_v39 = vpop.permute.xlu1 %248 }
  0xb9   : > { %v234_v52 = vmul.f32 %v221_v34, %v194_v38  ;;  %v235_v53 = vmul.f32 %v225_v35, %v194_v38  ;;  %v236_v54 = vmul.f32 %v229_v36, %v194_v38  ;;  %v237_v55 = vmul.f32 %v233_v37, %v194_v38 }
  0xba   : > { %v287_v56 = vmul.f32 %v274_v40, %v249_v39  ;;  %v288_v57 = vmul.f32 %v278_v41, %v249_v39  ;;  %v289_v58 = vmul.f32 %v282_v42, %v249_v39  ;;  %v290_v59 = vmul.f32 %v286_v43, %v249_v39 }
  0xbc   : > { %v241_v60 = vpop.permute.xlu0 %240 }
  0xbd   : > { %v243_v61 = vadd.f32 %v241_v60, %v234_v52  ;;  %v244_v62 = vadd.f32 %v241_v60, %v235_v53  ;;  %v245_v63 = vadd.f32 %v241_v60, %v236_v54  ;;  %v246_v0 = vadd.f32 %v241_v60, %v237_v55  ;;  %v297_v1 = vpop.permute.xlu1 %296 }
  0xbe   : > { %v335_v2 = vmul.f32 %v322_v44, %v297_v1  ;;  %v336_v3 = vmul.f32 %v326_v45, %v297_v1  ;;  %v337_v4 = vmul.f32 %v330_v46, %v297_v1  ;;  %v338_v5 = vmul.f32 %v334_v47, %v297_v1 }
  0xbf   : > { %v291_v6 = vadd.f32 %v287_v56, %v243_v61  ;;  %v292_v7 = vadd.f32 %v288_v57, %v244_v62  ;;  %v293_v8 = vadd.f32 %v289_v58, %v245_v63  ;;  %v294_v9 = vadd.f32 %v290_v59, %v246_v0 }
  0xc1   : > { %v339_v10 = vadd.f32 %v335_v2, %v291_v6  ;;  %v340_v11 = vadd.f32 %v336_v3, %v292_v7  ;;  %v341_v12 = vadd.f32 %v337_v4, %v293_v8  ;;  %v345_v13 = vpop.permute.xlu0 %344  ;;  %v342_v14 = vadd.f32 %v338_v5, %v294_v9 }
  0xc2   : > { %v383_v15 = vmul.f32 %v370_v48, %v345_v13  ;;  %v384_v16 = vmul.f32 %v374_v49, %v345_v13  ;;  %v385_v17 = vmul.f32 %v378_v50, %v345_v13  ;;  %v386_v18 = vmul.f32 %v382_v51, %v345_v13 }
  0xc4   : > { %v387_v19 = vadd.f32 %v383_v15, %v339_v10  ;;  %v388_v20 = vadd.f32 %v384_v16, %v340_v11  ;;  %v389_v21 = vadd.f32 %v385_v17, %v341_v12  ;;  %v390_v22 = vadd.f32 %v386_v18, %v342_v14 }
  0xc6   : > { %v392_v23 = vsel %vm391_vm0, %v387_v19, 0.0  ;;  %v393_v24 = vsel %vm391_vm0, %v388_v20, 0.0  ;;  %v395_v26 = vsel %vm391_vm0, %v389_v21, 0.0  ;;  %v397_v28 = vsel %vm391_vm0, %v390_v22, 0.0 }
  0xc7   : > { %v394_v25 = vadd.f32 %v393_v24, %v392_v23 }
  0xc9   : > { %v396_v27 = vadd.f32 %v395_v26, %v394_v25 }
  0xcb   : > { %v398_v29 = vadd.f32 %v397_v28, %v396_v27 }
  0xcd   : > { %399 = vadd.xlane.f32.xlu1 %v398_v29 }
 0x15a   : > { %v400_v30 = vpop.xlane.xlu1 %399 }
 0x15b   : > { %v402_v31 = vmul.f32 0.001953125, %v400_v30 }
 0x15d   : > { %v403_v32 = vsub.f32 %v387_v19, %v402_v31  ;;  %v404_v33 = vsub.f32 %v388_v20, %v402_v31  ;;  %v405_v34 = vsub.f32 %v389_v21, %v402_v31  ;;  %v406_v35 = vsub.f32 %v390_v22, %v402_v31 }
 0x15f   : > { %v407_v36 = vmul.f32 %v403_v32, %v403_v32  ;;  %v408_v37 = vmul.f32 %v404_v33, %v404_v33  ;;  %v409_v38 = vmul.f32 %v405_v34, %v405_v34  ;;  %v410_v39 = vmul.f32 %v406_v35, %v406_v35 }
 0x161   : > { %v411_v40 = vsel %vm391_vm0, %v407_v36, 0.0  ;;  %v412_v41 = vsel %vm391_vm0, %v408_v37, 0.0  ;;  %v414_v43 = vsel %vm391_vm0, %v409_v38, 0.0  ;;  %v416_v45 = vsel %vm391_vm0, %v410_v39, 0.0 }
 0x162   : > { %v413_v42 = vadd.f32 %v412_v41, %v411_v40 }
 0x164   : > { %v415_v44 = vadd.f32 %v414_v43, %v413_v42 }
 0x166   : > { %v417_v46 = vadd.f32 %v416_v45, %v415_v44 }
 0x168   : > { %418 = vadd.xlane.f32.xlu0 %v417_v46 }
 0x1f5   : > { %v419_v47 = vpop.xlane.xlu0 %418 }
 0x1f6   : > { %v420_v48 = vmul.f32 0.001953125, %v419_v47 }
 0x1f8   : > { %v421_v49 = vadd.f32 1e-05, %v420_v48 }
 0x1fa   : > { %680 = vrsqrt.f32 %v421_v49 }
 0x204   : > { %v681_v50 = vpop.eup %680 }
 0x205   : > { %v423_v51 = vmul.f32 %v681_v50, %v403_v32  ;;  %v424_v52 = vmul.f32 %v681_v50, %v404_v33  ;;  %v425_v53 = vmul.f32 %v681_v50, %v405_v34  ;;  %v426_v54 = vmul.f32 %v681_v50, %v406_v35 }
 0x207   : > { %v427_v55 = vsel %vm391_vm0, %v423_v51, -inf  ;;  %v434_v56 = vsel %vm391_vm0, %v424_v52, -inf  ;;  %v441_v57 = vsel %vm391_vm0, %v425_v53, -inf  ;;  %v448_v58 = vsel %vm391_vm0, %v426_v54, -inf }
 0x208   : > { %v428_v59 = vrot.slane %v427_v55, 4  ;;  %v435_v60 = vrot.slane %v434_v56, 4  ;;  %v442_v61 = vrot.slane %v441_v57, 4  ;;  %v449_v62 = vrot.slane %v448_v58, 4 }
 0x20a   : > { %v429_v63 = vmax.f32 %v427_v55, %v428_v59  ;;  %v436_v0 = vmax.f32 %v434_v56, %v435_v60  ;;  %v443_v1 = vmax.f32 %v441_v57, %v442_v61  ;;  %v450_v2 = vmax.f32 %v448_v58, %v449_v62 }
 0x20c   : > { %v430_v3 = vrot.slane %v429_v63, 2  ;;  %v437_v4 = vrot.slane %v436_v0, 2  ;;  %v444_v5 = vrot.slane %v443_v1, 2  ;;  %v451_v6 = vrot.slane %v450_v2, 2 }
 0x20e   : > { %v431_v7 = vmax.f32 %v429_v63, %v430_v3  ;;  %v438_v8 = vmax.f32 %v436_v0, %v437_v4  ;;  %v445_v9 = vmax.f32 %v443_v1, %v444_v5  ;;  %v452_v10 = vmax.f32 %v450_v2, %v451_v6 }
 0x210   : > { %v432_v11 = vrot.slane %v431_v7, 1  ;;  %v439_v12 = vrot.slane %v438_v8, 1  ;;  %v446_v13 = vrot.slane %v445_v9, 1  ;;  %v453_v14 = vrot.slane %v452_v10, 1 }
 0x212   : > { %v433_v15 = vmax.f32 %v431_v7, %v432_v11  ;;  %v440_v16 = vmax.f32 %v438_v8, %v439_v12  ;;  %v447_v17 = vmax.f32 %v445_v9, %v446_v13  ;;  %v454_v18 = vmax.f32 %v452_v10, %v453_v14 }
 0x214   : > { %v455_v19 = vsub.f32 %v423_v51, %v433_v15  ;;  %v456_v20 = vsub.f32 %v424_v52, %v440_v16  ;;  %v457_v21 = vsub.f32 %v425_v53, %v447_v17  ;;  %v458_v22 = vsub.f32 %v426_v54, %v454_v18 }
 0x216   : > { %v459_v23 = vmul.f32 1.442695, %v455_v19  ;;  %v461_v24 = vmul.f32 1.442695, %v456_v20  ;;  %v463_v25 = vmul.f32 1.442695, %v457_v21 }
 0x217   : > { %v465_v26 = vmul.f32 1.442695, %v458_v22 }
 0x218   : > { %682 = vpow2.f32 %v459_v23 }
 0x219   : > { %684 = vpow2.f32 %v461_v24 }
 0x21a   : > { %686 = vpow2.f32 %v463_v25 }
 0x21b   : > { %688 = vpow2.f32 %v465_v26 }
 0x222   : > { %v683_v27 = vpop.eup %682 }
 0x223   : > { %v685_v28 = vpop.eup %684  ;;  %v467_v29 = vsel %vm391_vm0, %v683_v27, 0.0 }
 0x224   : > { %v687_v30 = vpop.eup %686  ;;  %v468_v31 = vrot.slane %v467_v29, 4  ;;  %v474_v32 = vsel %vm391_vm0, %v685_v28, 0.0 }
 0x225   : > { %v689_v33 = vpop.eup %688  ;;  %v475_v34 = vrot.slane %v474_v32, 4  ;;  %v481_v35 = vsel %vm391_vm0, %v687_v30, 0.0 }
 0x226   : > { %v469_v36 = vadd.f32 %v468_v31, %v467_v29  ;;  %v482_v37 = vrot.slane %v481_v35, 4  ;;  %v488_v38 = vsel %vm391_vm0, %v689_v33, 0.0 }
 0x227   : > { %v476_v39 = vadd.f32 %v475_v34, %v474_v32  ;;  %v489_v40 = vrot.slane %v488_v38, 4 }
 0x228   : > { %v470_v41 = vrot.slane %v469_v36, 2  ;;  %v483_v42 = vadd.f32 %v482_v37, %v481_v35 }
 0x229   : > { %v477_v43 = vrot.slane %v476_v39, 2  ;;  %v490_v44 = vadd.f32 %v489_v40, %v488_v38 }
 0x22a   : > { %v471_v45 = vadd.f32 %v470_v41, %v469_v36  ;;  %v484_v46 = vrot.slane %v483_v42, 2 }
 0x22b   : > { %v478_v47 = vadd.f32 %v477_v43, %v476_v39  ;;  %v491_v48 = vrot.slane %v490_v44, 2 }
 0x22c   : > { %v472_v49 = vrot.slane %v471_v45, 1  ;;  %v485_v50 = vadd.f32 %v484_v46, %v483_v42 }
 0x22d   : > { %v479_v51 = vrot.slane %v478_v47, 1  ;;  %v492_v52 = vadd.f32 %v491_v48, %v490_v44 }
 0x22e   : > { %v473_v53 = vadd.f32 %v472_v49, %v471_v45  ;;  %v486_v54 = vrot.slane %v485_v50, 1 }
 0x22f   : > { %v480_v55 = vadd.f32 %v479_v51, %v478_v47  ;;  %v493_v56 = vrot.slane %v492_v52, 1 }
 0x230   : > { %v487_v57 = vadd.f32 %v486_v54, %v485_v50  ;;  %690 = vrcp.f32 %v473_v53 }
 0x231   : > { %v494_v58 = vadd.f32 %v493_v56, %v492_v52  ;;  %692 = vrcp.f32 %v480_v55 }
 0x232   : > { %694 = vrcp.f32 %v487_v57 }
 0x233   : > { %696 = vrcp.f32 %v494_v58 }
 0x23a   : > { %v691_v59 = vpop.eup %690 }
 0x23b   : > { %v693_v60 = vpop.eup %692  ;;  %v499_v61 = vmul.f32 %v691_v59, %v473_v53 }
 0x23c   : > { %v695_v62 = vpop.eup %694  ;;  %v500_v63 = vmul.f32 %v693_v60, %v480_v55 }
 0x23d   : > { %v697_v0 = vpop.eup %696  ;;  %v501_v1 = vmul.f32 %v695_v62, %v487_v57  ;;  %v503_v2 = vsub.f32 2.0, %v499_v61 }
 0x23e   : > { %v502_v3 = vmul.f32 %v697_v0, %v494_v58  ;;  %v504_v4 = vsub.f32 2.0, %v500_v63 }
 0x23f   : > { %v505_v5 = vsub.f32 2.0, %v501_v1  ;;  %v507_v6 = vmul.f32 %v691_v59, %v503_v2 }
 0x240   : > { %v506_v7 = vsub.f32 2.0, %v502_v3  ;;  %v508_v8 = vmul.f32 %v693_v60, %v504_v4 }
 0x241   : > { %v509_v9 = vmul.f32 %v695_v62, %v505_v5  ;;  %v511_v10 = vmul.f32 %v683_v27, %v507_v6 }
 0x242   : > { %v510_v11 = vmul.f32 %v697_v0, %v506_v7  ;;  %v512_v12 = vmul.f32 %v685_v28, %v508_v8 }
 0x243   : > { %v513_v13 = vmul.f32 %v687_v30, %v509_v9 }
 0x244   : > { %v514_v14 = vmul.f32 %v689_v33, %v510_v11  ;;  %v519_v15 = vcombine.low %v511_v10, %v512_v12 }
 0x246   : > { %v520_v16 = vcombine.low %v513_v13, %v514_v14  ;;  %523 = vst [vmem:[%s186_s10] sm:$0xff] %v519_v15 }
 0x248   : > { %524 = vst [vmem:[%s186_s10 + $0x8] sm:$0xff] %v520_v16 }
 0x249   : > { %741 = shalt.err (!%p738_p4)
}
 0x24a   : > { %s742_s29 = scalar_lea.hbm %s973_s20, 256  ;;  %s746_s7 = scalar_lea.hbm %s1020_s3, 512 }
 0x24b   : > { %p743_p5 = scmp.ne.s32.totalorder %s973_s20, %s742_s29  ;;  %p747_p0 = scmp.lt.u32.totalorder %s973_s20, %s1020_s3 }
 0x24c   : > { %p748_p1 = scmp.lt.u32.totalorder %s746_s7, %s742_s29  ;;  %p750_p6 = scmp.lt.u32.totalorder %s742_s29, %s973_s20 }
 0x24d   : > { %p744_p8 = pnand %p743_p5, %p1029_p11 }
 0x24e   : > { %p749_p3 = por %p748_p1, %p747_p0 }
 0x24f   : > { %p745_p9 = pneg %p744_p8 }
 0x250   : > { %p751_p12 = por %p750_p6, %p749_p3 }
 0x252   : > { %p752_p13 = pnand %p751_p12, %p745_p9 }
 0x254   : > { %755 = shalt.err (!%p752_p13)
}
 0x255   : > { %628 = dma.vmem_to_hbm [thread:$0]  (%p1029_p11), %s975_s11, 256, %s973_s20, %s526_s22  }
 0x256 PF: > { %s552_s8 = sand.u32 1, %s782_s12   ;;  %p1030_p7 = scmp.ne.s32.totalorder %s1025_s25, 0 }
 0x257   : > { %p1031_p10 = scmp.ge.s32.totalorder %s794_s15, 2  ;;  %s553_s9 = scalar_lea.sflag [#allocation4], %s552_s8 }
 0x259   : > { %p635_p2 = pnand %p1031_p10, %p1030_p7 }
 0x25b   : > { %777 = dma.done.wait (!%p635_p2), %s553_s9, 256  }
 0x25c   : > { %779 = vsyncadd (!%p635_p2), %s553_s9, 4294967040  ;;  %p16_p4 = scmp.ge.s32.totalorder %s847_s18, 4   ;;  %s1032_s12 = smov %s786_s13 }
 0x25d   : > { %s1033_s13 = smov %s790_s14  ;;  %s1034_s14 = smov %s859_s21 }
 0x25e   : > { %s1035_s15 = smov %s847_s18  ;;  %18 = sbr.rel (!%p16_p4) target bundleno = 5 (0x5), region = 77 }
 0x265   :  { %558 = vsyncpa [#allocation3], 1 }
 0x266   :  { %560 = vsyncpa [#allocation3 + $0x1], 1 }
 0x267   :  { %561 = vsyncpa [#allocation4], 1 }
 0x268   :  { %563 = vsyncpa [#allocation4 + $0x1], 1 }

</bundles_post_ra>
